<compile_context>
chip_gen: v6e
topology: v6e:2x2x1
jax: 0.10.0
libtpu: 0.0.40
codegen_flags: <defaults>
</compile_context>

<pallas_src>
import math

import jax
import jax.numpy as jnp
from jax.experimental import pallas as pl
from jax.experimental.pallas import tpu as pltpu

LANE = 128
_MAX_BLOCK_ROWS = 2048  # 2048 * 128 * 4 B = 1 MiB per f32 input buffer


def _pick_tiles(batch, rows):
    """Choose (images_per_block, rows_per_block)."""
    if rows <= _MAX_BLOCK_ROWS:
        # Small images: pack several per block to amortize the ~0.35 us/step
        # grid overhead, but keep >=2 batch blocks when possible so the batch
        # axis can shard across TensorCores (v7x megacore).
        max_bt = max(1, _MAX_BLOCK_ROWS // rows)
        bt = 1
        for d in range(1, batch + 1):
            if batch % d == 0 and d <= max_bt and (batch == 1 or batch // d >= 2):
                bt = d
        return bt, rows
    # Large images: one image per block, chunk its rows.  The row chunk must
    # be a multiple of 8 (sublane tiling) that divides R; fall back to the
    # whole image if no such divisor exists.
    tr = rows
    for cand in range(min(rows, _MAX_BLOCK_ROWS), 7, -1):
        if rows % cand == 0 and cand % 8 == 0:
            tr = cand
            break
    return 1, tr


def _unet_loss_kernel(x_ref, t_ref, bce_ref, inter_ref, den_ref):
    j = pl.program_id(1)  # row-chunk (reduction) axis

    @pl.when(j == 0)
    def _init():
        bce_ref[...] = jnp.zeros_like(bce_ref)
        inter_ref[...] = jnp.zeros_like(inter_ref)
        den_ref[...] = jnp.zeros_like(den_ref)

    x = x_ref[...].astype(jnp.float32)  # (Bt, TR, 128) logits
    t = t_ref[...].astype(jnp.float32)

    # Logits-form BCE (one exp + one log per element), preserving the
    # nn.BCELoss clamp: each -log term limited to 100.
    #   -log(sigmoid(x))     = log(1 + e^-|x|) + max(-x, 0)
    #   -log(1 - sigmoid(x)) = log(1 + e^-|x|) + max( x, 0)
    ax = jnp.abs(x)
    e = jnp.exp(-ax)
    sp = jnp.log(1.0 + e)
    nlog_p = jnp.minimum(sp + jnp.maximum(-x, 0.0), 100.0)
    nlog_1mp = jnp.minimum(sp + jnp.maximum(x, 0.0), 100.0)
    bce = t * nlog_p + (1.0 - t) * nlog_1mp

    # sigmoid(x) reusing e = exp(-|x|): approximate EUP reciprocal + one
    # Newton step (full f32 accuracy, no extra transcendental).
    d = 1.0 + e
    r = pl.reciprocal(d, approx=True)
    r = r * (2.0 - d * r)
    p = jnp.where(x >= 0.0, r, e * r)

    # Per-image lane-wise partial sums; cross-lane collapse is deferred to
    # the tiny JAX epilogue outside the kernel.
    bce_ref[...] += jnp.sum(bce, axis=1)[None]
    inter_ref[...] += jnp.sum(p * t, axis=1)[None]
    den_ref[...] += jnp.sum(p + t, axis=1)[None]


def unet_loss_pallas(output, target):
    """Pallas implementation of UnetLoss.forward.

    output: raw logits, (B, C, H, W); sigmoid is applied inside the kernel.
    target: labels in [0, 1], same shape.
    Returns (loss, aux) with aux = [dice_batch_loss, bce_loss] (the values the
    torch module prints).
    """
    B = output.shape[0]
    N = int(math.prod(output.shape[1:]))
    assert N % LANE == 0, "per-image element count must be a multiple of 128"
    R = N // LANE

    # reshape is a free metadata change for contiguous NCHW; no dtype cast
    # here (casting happens on the VMEM tile inside the kernel).
    out3 = output.reshape(B, R, LANE)
    tgt3 = target.reshape(B, R, LANE)

    Bt, TR = _pick_tiles(B, R)
    n_bb = B // Bt
    n_rc = R // TR

    part_shape = jax.ShapeDtypeStruct((n_bb, Bt, LANE), jnp.float32)
    part_spec = pl.BlockSpec((1, Bt, LANE), lambda i, j: (i, 0, 0))

    # Scoped-VMEM budget (double-buffered inputs + resident outputs); only
    # raise the limit when the fallback whole-image path needs it (v5e's
    # default scoped limit is 16 MiB).
    block_bytes = Bt * TR * LANE * (
        jnp.dtype(output.dtype).itemsize + jnp.dtype(target.dtype).itemsize
    )
    vmem_need = 2 * block_bytes + 3 * 2 * Bt * LANE * 4
    vmem_limit = int(vmem_need + (4 << 20)) if vmem_need > (12 << 20) else None

    bce_lanes, inter_lanes, den_lanes = pl.pallas_call(
        _unet_loss_kernel,
        out_shape=(part_shape, part_shape, part_shape),
        grid=(n_bb, n_rc),
        in_specs=[
            pl.BlockSpec((Bt, TR, LANE), lambda i, j: (i, j, 0)),
            pl.BlockSpec((Bt, TR, LANE), lambda i, j: (i, j, 0)),
        ],
        out_specs=(part_spec, part_spec, part_spec),
        compiler_params=pltpu.CompilerParams(
            dimension_semantics=("parallel", "arbitrary"),
            vmem_limit_bytes=vmem_limit,
        ),
    )(out3, tgt3)

    # Tiny epilogue in plain JAX: cross-lane collapse + final combine.
    bce_mean = bce_lanes.sum() / float(B * N)
    inter = inter_lanes.reshape(B, LANE).sum(axis=1)
    den = den_lanes.reshape(B, LANE).sum(axis=1)
    # NOTE: like the torch module, no smoothing term in the dice denominator
    # (all-zero p and t would give 0/0), to preserve forward semantics.
    dice = 2.0 * inter / den
    dice_batch_loss = 1.0 - dice.sum() / float(B)
    loss = 0.5 * bce_mean + dice_batch_loss
    # TODO(synk): the torch module print()s (dice_batch_loss, bce_loss) inside
    # forward; they are returned as `aux` instead of printing.
    aux = jnp.stack([dice_batch_loss, bce_mean])
    return loss, aux


def unet_loss_reference(output, target):
    """Pure-JAX reference matching the PyTorch module exactly."""
    p = jax.nn.sigmoid(output.astype(jnp.float32))
    t = target.astype(jnp.float32)
    pf = p.reshape(-1)
    tf = t.reshape(-1)
    bce = -jnp.mean(
        tf * jnp.maximum(jnp.log(pf), -100.0)
        + (1.0 - tf) * jnp.maximum(jnp.log(1.0 - pf), -100.0)
    )
    B = output.shape[0]
    pd = p.reshape(B, -1)
    td = t.reshape(B, -1)
    intersection = (pd * td).sum(1)
    dice = 2.0 * intersection / (pd.sum(1) + td.sum(1))
    dice_loss = 1.0 - dice.sum() / B
    return 0.5 * bce + dice_loss, jnp.stack([dice_loss, bce])


if __name__ == "__main__":
    key = jax.random.PRNGKey(0)
    k1, k2 = jax.random.split(key)

    # Small UNet-like logits: batch=2, channels=4, 16x16 spatial (NCHW).
    x = jax.random.normal(k1, (2, 4, 16, 16), dtype=jnp.float32)
    y = jax.random.bernoulli(k2, 0.3, (2, 4, 16, 16)).astype(jnp.float32)

    loss, aux = unet_loss_pallas(x, y)
    loss = jax.block_until_ready(loss)

    ref_loss, ref_aux = unet_loss_reference(x, y)
    ref_loss = jax.block_until_ready(ref_loss)

    assert jnp.allclose(loss, ref_loss, rtol=1e-4, atol=1e-5), (loss, ref_loss)
    assert jnp.allclose(aux, ref_aux, rtol=1e-4, atol=1e-5), (aux, ref_aux)

    print("KERNEL_OK")
</pallas_src>

<mosaic_0001>
module attributes {stable_mosaic.version = 11 : i64} {
  func.func @_unet_loss_kernel(%arg0: i32, %arg1: i32, %arg2: memref<1x8x128xf32, #tpu.memory_space<vmem>>, %arg3: memref<1x8x128xf32, #tpu.memory_space<vmem>>, %arg4: memref<1x1x128xf32, #tpu.memory_space<vmem>>, %arg5: memref<1x1x128xf32, #tpu.memory_space<vmem>>, %arg6: memref<1x1x128xf32, #tpu.memory_space<vmem>>) attributes {dimension_semantics = [#tpu.dimension_semantics<parallel>, #tpu.dimension_semantics<arbitrary>], iteration_bounds = array<i64: 2, 1>, scalar_prefetch = 0 : i64, scratch_operands = 0 : i64, tpu.core_type = #tpu.core_type<tc>, window_params = [{transform_indices = @transform_0, window_bounds = array<i64: 1, 8, 128>}, {transform_indices = @transform_1, window_bounds = array<i64: 1, 8, 128>}, {transform_indices = @transform_2, window_bounds = array<i64: 1, 1, 128>}, {transform_indices = @transform_3, window_bounds = array<i64: 1, 1, 128>}, {transform_indices = @transform_4, window_bounds = array<i64: 1, 1, 128>}]} {
    %c0_i32 = arith.constant 0 : i32
    %0 = arith.cmpi eq, %arg1, %c0_i32 : i32
    %1 = arith.extui %0 : i1 to i32
    %c0_i32_0 = arith.constant 0 : i32
    %2 = arith.cmpi ne, %1, %c0_i32_0 : i32
    scf.if %2 {
      %cst_37 = arith.constant 0.000000e+00 : f32
      %57 = vector.broadcast %cst_37 : f32 to vector<1x1x128xf32>
      %c0_38 = arith.constant 0 : index
      %c0_39 = arith.constant 0 : index
      %c0_40 = arith.constant 0 : index
      %58 = vector.load %arg4[%c0_38, %c0_39, %c0_40] : memref<1x1x128xf32, #tpu.memory_space<vmem>>, vector<1x1x128xf32>
      tpu.vector_store %arg4[%c0_38, %c0_39, %c0_40], %57 {strides = array<i32>} : memref<1x1x128xf32, #tpu.memory_space<vmem>>, vector<1x1x128xf32>,
      %cst_41 = arith.constant 0.000000e+00 : f32
      %59 = vector.broadcast %cst_41 : f32 to vector<1x1x128xf32>
      %c0_42 = arith.constant 0 : index
      %c0_43 = arith.constant 0 : index
      %c0_44 = arith.constant 0 : index
      %60 = vector.load %arg5[%c0_42, %c0_43, %c0_44] : memref<1x1x128xf32, #tpu.memory_space<vmem>>, vector<1x1x128xf32>
      tpu.vector_store %arg5[%c0_42, %c0_43, %c0_44], %59 {strides = array<i32>} : memref<1x1x128xf32, #tpu.memory_space<vmem>>, vector<1x1x128xf32>,
      %cst_45 = arith.constant 0.000000e+00 : f32
      %61 = vector.broadcast %cst_45 : f32 to vector<1x1x128xf32>
      %c0_46 = arith.constant 0 : index
      %c0_47 = arith.constant 0 : index
      %c0_48 = arith.constant 0 : index
      %62 = vector.load %arg6[%c0_46, %c0_47, %c0_48] : memref<1x1x128xf32, #tpu.memory_space<vmem>>, vector<1x1x128xf32>
      tpu.vector_store %arg6[%c0_46, %c0_47, %c0_48], %61 {strides = array<i32>} : memref<1x1x128xf32, #tpu.memory_space<vmem>>, vector<1x1x128xf32>,
    } else {
    }
    %c0 = arith.constant 0 : index
    %c0_1 = arith.constant 0 : index
    %c0_2 = arith.constant 0 : index
    %3 = vector.load %arg2[%c0, %c0_1, %c0_2] : memref<1x8x128xf32, #tpu.memory_space<vmem>>, vector<1x8x128xf32>
    %c0_3 = arith.constant 0 : index
    %c0_4 = arith.constant 0 : index
    %c0_5 = arith.constant 0 : index
    %4 = vector.load %arg3[%c0_3, %c0_4, %c0_5] : memref<1x8x128xf32, #tpu.memory_space<vmem>>, vector<1x8x128xf32>
    %5 = math.absf %3 : vector<1x8x128xf32>
    %cst = arith.constant 0.000000e+00 : f32
    %6 = vector.broadcast %cst : f32 to vector<1x8x128xf32>
    %7 = arith.subf %6, %5 : vector<1x8x128xf32>
    %8 = math.exp %7 : vector<1x8x128xf32>
    %cst_6 = arith.constant 1.000000e+00 : f32
    %9 = vector.broadcast %cst_6 : f32 to vector<1x8x128xf32>
    %10 = arith.addf %9, %8 : vector<1x8x128xf32>
    %11 = math.log %10 : vector<1x8x128xf32>
    %cst_7 = arith.constant 0.000000e+00 : f32
    %12 = vector.broadcast %cst_7 : f32 to vector<1x8x128xf32>
    %13 = arith.subf %12, %3 : vector<1x8x128xf32>
    %cst_8 = arith.constant 0.000000e+00 : f32
    %14 = vector.broadcast %cst_8 : f32 to vector<1x8x128xf32>
    %15 = arith.maximumf %13, %14 : vector<1x8x128xf32>
    %16 = arith.addf %11, %15 : vector<1x8x128xf32>
    %cst_9 = arith.constant 1.000000e+02 : f32
    %17 = vector.broadcast %cst_9 : f32 to vector<1x8x128xf32>
    %18 = arith.minimumf %16, %17 : vector<1x8x128xf32>
    %cst_10 = arith.constant 0.000000e+00 : f32
    %19 = vector.broadcast %cst_10 : f32 to vector<1x8x128xf32>
    %20 = arith.maximumf %3, %19 : vector<1x8x128xf32>
    %21 = arith.addf %11, %20 : vector<1x8x128xf32>
    %cst_11 = arith.constant 1.000000e+02 : f32
    %22 = vector.broadcast %cst_11 : f32 to vector<1x8x128xf32>
    %23 = arith.minimumf %21, %22 : vector<1x8x128xf32>
    %24 = arith.mulf %4, %18 : vector<1x8x128xf32>
    %cst_12 = arith.constant 1.000000e+00 : f32
    %25 = vector.broadcast %cst_12 : f32 to vector<1x8x128xf32>
    %26 = arith.subf %25, %4 : vector<1x8x128xf32>
    %27 = arith.mulf %26, %23 : vector<1x8x128xf32>
    %28 = arith.addf %24, %27 : vector<1x8x128xf32>
    %cst_13 = arith.constant 1.000000e+00 : f32
    %29 = vector.broadcast %cst_13 : f32 to vector<1x8x128xf32>
    %30 = arith.addf %29, %8 : vector<1x8x128xf32>
    %31 = tpu.reciprocal %30 {approx = true} : vector<1x8x128xf32> -> vector<1x8x128xf32>
    %32 = arith.mulf %30, %31 : vector<1x8x128xf32>
    %cst_14 = arith.constant 2.000000e+00 : f32
    %33 = vector.broadcast %cst_14 : f32 to vector<1x8x128xf32>
    %34 = arith.subf %33, %32 : vector<1x8x128xf32>
    %35 = arith.mulf %31, %34 : vector<1x8x128xf32>
    %cst_15 = arith.constant 0.000000e+00 : f32
    %36 = vector.broadcast %cst_15 : f32 to vector<1x8x128xf32>
    %37 = arith.cmpf oge, %3, %36 : vector<1x8x128xf32>
    %38 = arith.mulf %8, %35 : vector<1x8x128xf32>
    %39 = arith.select %37, %35, %38 : vector<1x8x128xi1>, vector<1x8x128xf32>
    %c0_16 = arith.constant 0 : index
    %c0_17 = arith.constant 0 : index
    %c0_18 = arith.constant 0 : index
    %40 = vector.load %arg4[%c0_16, %c0_17, %c0_18] : memref<1x1x128xf32, #tpu.memory_space<vmem>>, vector<1x1x128xf32>
    %cst_19 = arith.constant dense<0.000000e+00> : vector<1x128xf32>
    %41 = vector.multi_reduction <add>, %28, %cst_19 [1] : vector<1x8x128xf32> to vector<1x128xf32>
    %42 = vector.shape_cast %41 : vector<1x128xf32> to vector<1x1x128xf32>
    %43 = arith.addf %40, %42 : vector<1x1x128xf32>
    %c0_20 = arith.constant 0 : index
    %c0_21 = arith.constant 0 : index
    %c0_22 = arith.constant 0 : index
    %44 = vector.load %arg4[%c0_20, %c0_21, %c0_22] : memref<1x1x128xf32, #tpu.memory_space<vmem>>, vector<1x1x128xf32>
    tpu.vector_store %arg4[%c0_20, %c0_21, %c0_22], %43 {strides = array<i32>} : memref<1x1x128xf32, #tpu.memory_space<vmem>>, vector<1x1x128xf32>,
    %c0_23 = arith.constant 0 : index
    %c0_24 = arith.constant 0 : index
    %c0_25 = arith.constant 0 : index
    %45 = vector.load %arg5[%c0_23, %c0_24, %c0_25] : memref<1x1x128xf32, #tpu.memory_space<vmem>>, vector<1x1x128xf32>
    %46 = arith.mulf %39, %4 : vector<1x8x128xf32>
    %cst_26 = arith.constant dense<0.000000e+00> : vector<1x128xf32>
    %47 = vector.multi_reduction <add>, %46, %cst_26 [1] : vector<1x8x128xf32> to vector<1x128xf32>
    %48 = vector.shape_cast %47 : vector<1x128xf32> to vector<1x1x128xf32>
    %49 = arith.addf %45, %48 : vector<1x1x128xf32>
    %c0_27 = arith.constant 0 : index
    %c0_28 = arith.constant 0 : index
    %c0_29 = arith.constant 0 : index
    %50 = vector.load %arg5[%c0_27, %c0_28, %c0_29] : memref<1x1x128xf32, #tpu.memory_space<vmem>>, vector<1x1x128xf32>
    tpu.vector_store %arg5[%c0_27, %c0_28, %c0_29], %49 {strides = array<i32>} : memref<1x1x128xf32, #tpu.memory_space<vmem>>, vector<1x1x128xf32>,
    %c0_30 = arith.constant 0 : index
    %c0_31 = arith.constant 0 : index
    %c0_32 = arith.constant 0 : index
    %51 = vector.load %arg6[%c0_30, %c0_31, %c0_32] : memref<1x1x128xf32, #tpu.memory_space<vmem>>, vector<1x1x128xf32>
    %52 = arith.addf %39, %4 : vector<1x8x128xf32>
    %cst_33 = arith.constant dense<0.000000e+00> : vector<1x128xf32>
    %53 = vector.multi_reduction <add>, %52, %cst_33 [1] : vector<1x8x128xf32> to vector<1x128xf32>
    %54 = vector.shape_cast %53 : vector<1x128xf32> to vector<1x1x128xf32>
    %55 = arith.addf %51, %54 : vector<1x1x128xf32>
    %c0_34 = arith.constant 0 : index
    %c0_35 = arith.constant 0 : index
    %c0_36 = arith.constant 0 : index
    %56 = vector.load %arg6[%c0_34, %c0_35, %c0_36] : memref<1x1x128xf32, #tpu.memory_space<vmem>>, vector<1x1x128xf32>
    tpu.vector_store %arg6[%c0_34, %c0_35, %c0_36], %55 {strides = array<i32>} : memref<1x1x128xf32, #tpu.memory_space<vmem>>, vector<1x1x128xf32>,
    return
  }
  func.func @transform_0(%arg0: i32, %arg1: i32) -> (i32, i32, i32) {
    %c0_i32 = arith.constant 0 : i32
    %c0_i32_0 = arith.constant 0 : i32
    return %arg0, %arg1, %c0_i32 : i32, i32, i32
  }
  func.func @transform_1(%arg0: i32, %arg1: i32) -> (i32, i32, i32) {
    %c0_i32 = arith.constant 0 : i32
    %c0_i32_0 = arith.constant 0 : i32
    return %arg0, %arg1, %c0_i32 : i32, i32, i32
  }
  func.func @transform_2(%arg0: i32, %arg1: i32) -> (i32, i32, i32) {
    %c0_i32 = arith.constant 0 : i32
    %c0_i32_0 = arith.constant 0 : i32
    %c0_i32_1 = arith.constant 0 : i32
    return %arg0, %c0_i32, %c0_i32_0 : i32, i32, i32
  }
  func.func @transform_3(%arg0: i32, %arg1: i32) -> (i32, i32, i32) {
    %c0_i32 = arith.constant 0 : i32
    %c0_i32_0 = arith.constant 0 : i32
    %c0_i32_1 = arith.constant 0 : i32
    return %arg0, %c0_i32, %c0_i32_0 : i32, i32, i32
  }
  func.func @transform_4(%arg0: i32, %arg1: i32) -> (i32, i32, i32) {
    %c0_i32 = arith.constant 0 : i32
    %c0_i32_0 = arith.constant 0 : i32
    %c0_i32_1 = arith.constant 0 : i32
    return %arg0, %c0_i32, %c0_i32_0 : i32, i32, i32
  }
}

</mosaic_0001>

<bundles_post_ra>
// kernel: tpu_custom_call.1
= control target key start
LH: loop header
LB: loop body
LE: loop exit
PB: predicated region body
PF: predicated region fallthrough
CT: control target
= control target key end

     0   :  { %s1135_s0 = inlined_call_operand.hbm [shape: f32[2,8,128], index: 0, kind: input, shape index: {}]   ;;  %s1136_s1 = inlined_call_operand.hbm [shape: f32[2,8,128], index: 1, kind: input, shape index: {}]   ;;  %s1137_s2 = inlined_call_operand.hbm [shape: f32[2,1,128], index: 2, kind: output, shape index: {0}]   ;;  %s1138_s3 = inlined_call_operand.hbm [shape: f32[2,1,128], index: 3, kind: output, shape index: {1}]   ;;  %s1139_s4 = inlined_call_operand.hbm [shape: f32[2,1,128], index: 4, kind: output, shape index: {2}]  }
   0x1   :  { %1141 = sst [smem:[#allocation15_spill]] %s1135_s0 }
   0x2   :  { %1142 = sst [smem:[#allocation16_spill]] %s1136_s1 }
   0x3   :  { %10 = vsyncpa [#allocation3], 0 }
   0x4   :  { %12 = vsyncpa [#allocation3 + $0x1], 0 }
   0x5   :  { %13 = vsyncpa [#allocation6], 0 }
   0x6   :  { %15 = vsyncpa [#allocation6 + $0x1], 0 }
   0x7   :  { %16 = vsyncpa [#allocation4], 0 }
   0x8   :  { %18 = vsyncpa [#allocation4 + $0x1], 0 }
   0x9   :  { %19 = vsyncpa [#allocation9], 0 }
   0xa   :  { %21 = vsyncpa [#allocation9 + $0x1], 0  ;;  %s874_s15 = smov 0   ;;  %s876_s16 = smov 0  }
   0xb   :  { %s878_s17 = smov 0   ;;  %s880_s18 = smov 0  }
   0xc   :  { %s882_s19 = smov 0   ;;  %s884_s20 = smov 0  }
   0xd LB: > { %s905_s21 = sadd.s32 4294967295, %s841_s20   ;;  %s1140_s22 = sadd.s32 4294967294, %s841_s20   ;;  %s841_s20 = sphi %s884_s20, %s27_s20   ;;  %s837_s19 = sphi %s882_s19, %s1157_s19   ;;  %s833_s18 = sphi %s880_s18, %s1156_s18   ;;  %s829_s17 = sphi %s878_s17, %s1155_s17   ;;  %s825_s16 = sphi %s876_s16, %s1154_s16   ;;  %s821_s15 = sphi %s874_s15, %s1153_s15  }
   0xe   : > { %s39_s23 = sadd.s32 1, %s837_s19  ;;  %s48_s24 = sadd.s32 1, %s829_s17 }
   0xf   : > { %p41_p0 = scmp.ge.s32.totalorder %s39_s23, 2  ;;  %p55_p1 = scmp.ne.s32.totalorder %s829_s17, %s825_s16 }
  0x10   : > { %p56_p2 = scmp.eq.s32.totalorder %s841_s20, 0  ;;  %p61_p3 = scmp.ne.s32.totalorder %s825_s16, %s821_s15 }
  0x11   : > { %s1159_s23 = smov (%p41_p0, %s39_s23), 0  ;;  %p62_p5 = scmp.eq.s32.totalorder %s905_s21, 0 }
  0x12   : > { %p917_p4 = por %p56_p2, %p55_p1  ;;  %s43_s26 = ssub.s32 %s837_s19, %s1159_s23 }
  0x13   : > { %p113_p6 = scmp.eq.s32.totalorder %s905_s21, 1  ;;  %p46_p7 = scmp.eq.s32.totalorder %s43_s26, 0 }
  0x14   : > { %p925_p8 = por %p62_p5, %p61_p3  ;;  %p119_p10 = scmp.eq.s32.totalorder %s1140_s22, 1 }
  0x15   : > { %p929_p9 = por %p113_p6, %p55_p1  ;;  %p588_p13 = scmp.lt.s32.totalorder %s841_s20, 2 }
  0x16   : > { %s936_s29 = scalar_select %p46_p7, %s829_s17, %s48_s24  }
  0x17   : > { %p938_p11 = por %p119_p10, %p61_p3  ;;  %s945_s5 = sand.u32 1, %s829_s17  }
  0x18   : > { %s549_s6 = sshll.u32 %s945_s5, 3  ;;  %s550_s7 = sshll.u32 %s837_s19, 7 }
  0x19   : > { %s1147_s0 = sld [smem:[#allocation15_spill]]  ;;  %s195_s11 = scalar_lea.vmem [#allocation2], %s549_s6 }
  0x1a   : > { %s203_s12 = sshll.u32 %s195_s11, 4  ;;  %p954_p0 = pnand %p588_p13, %p917_p4  ;;  %s204_s12 = int_to_ptr.vmem [resolvable:$true] %s203_s12 }
  0x1b   : > { %p553_p1 = scmp.ge.s32.totalorder %s841_s20, 1  ;;  %p227_p2 = scmp.lt.s32.totalorder %s841_s20, 3 }
  0x1c   : > { %s192_s14 = scalar_lea.sflag [#allocation3], %s945_s5  ;;  %p647_p3 = pneg %p954_p0 }
  0x1d   : > { %s658_s24 = scalar_lea.vmem %s204_s12, 128  ;;  %s843_s26 = smov [#allocation2]  }
  0x1e   : > { %p659_p5 = scmp.ne.s32.totalorder %s204_s12, %s658_s24  ;;  %s663_s8 = sshll.u32 %s843_s26, 4  ;;  %s664_s8 = int_to_ptr.vmem [resolvable:$false] %s663_s8 }
  0x1f   : > { %s201_s10 = scalar_lea.hbm %s1147_s0, %s550_s7  ;;  %s665_s25 = scalar_lea.vmem %s664_s8, 256 }
  0x20   : > { %p661_p6 = pnand %p659_p5, %p647_p3  ;;  %p666_p4 = scmp.lt.s32.totalorder %s204_s12, %s664_s8 }
  0x21   : > { %p667_p10 = scmp.lt.s32.totalorder %s665_s25, %s658_s24 }
  0x22   : > { %p662_p7 = pneg %p661_p6 }
  0x23   : > { %p668_p13 = por %p667_p10, %p666_p4 }
  0x25   : > { %p669_p12 = pnand %p668_p13, %p662_p7 }
  0x27   : > { %672 = shalt.err (!%p669_p12)
}
  0x28   : > { %574 = dma.hbm_to_vmem [thread:$0]  (!%p954_p0), %s201_s10, 128, %s204_s12, %s192_s14  }
  0x29   : > { %p972_p5 = pnand %p553_p1, %p227_p2  ;;  %s1150_s1 = sld [smem:[#allocation16_spill]] }
  0x2a   : > { %s214_s8 = scalar_lea.vmem [#allocation5], %s549_s6  ;;  %s211_s22 = scalar_lea.sflag [#allocation6], %s945_s5 }
  0x2b   : > { %s222_s25 = sshll.u32 %s214_s8, 4  ;;  %s844_s10 = smov [#allocation5]   ;;  %s223_s25 = int_to_ptr.vmem [resolvable:$true] %s222_s25 }
  0x2c   : > { %s686_s0 = scalar_lea.vmem %s223_s25, 128  ;;  %s691_s12 = sshll.u32 %s844_s10, 4  ;;  %s692_s12 = int_to_ptr.vmem [resolvable:$false] %s691_s12 }
  0x2d   : > { %p687_p12 = scmp.ne.s32.totalorder %s223_s25, %s686_s0  ;;  %s693_s14 = scalar_lea.vmem %s692_s12, 256 }
  0x2e   : > { %p694_p1 = scmp.lt.s32.totalorder %s223_s25, %s692_s12  ;;  %p695_p2 = scmp.lt.s32.totalorder %s693_s14, %s686_s0 }
  0x2f   : > { %s220_s24 = scalar_lea.hbm %s1150_s1, %s550_s7  ;;  %p689_p6 = pnand %p687_p12, %p647_p3 }
  0x30   : > { %p696_p4 = por %p695_p2, %p694_p1 }
  0x31   : > { %p690_p7 = pneg %p689_p6 }
  0x33   : > { %p697_p10 = pnand %p696_p4, %p690_p7 }
  0x35   : > { %700 = shalt.err (!%p697_p10)
}
  0x36   : > { %577 = dma.hbm_to_vmem [thread:$0]  (!%p954_p0), %s220_s24, 128, %s223_s25, %s211_s22  }
  0x37   : > { %231 = sbr.rel (%p972_p5) target bundleno = 182 (0xb6), region = 28  ;;  %s988_s5 = sand.u32 (!%p972_p5), 1, %s825_s16  }
  0x38   : > { %s554_s6 = sshll.u32 (!%p972_p5), %s988_s5, 3  ;;  %s234_s7 = scalar_lea.sflag (!%p972_p5), [#allocation3], %s988_s5 }
  0x39   : > { %s237_s11 = scalar_lea.vmem (!%p972_p5), [#allocation2], %s554_s6 }
  0x3c   : > { %804 = dma.done.wait (%p925_p8), %s234_s7, 128  }
  0x3d   : > { %806 = vsyncadd (%p925_p8), %s234_s7, 4294967168  ;;  %s243_s0 = scalar_lea.sflag [#allocation6], %s988_s5  ;;  %s246_s22 = scalar_lea.vmem [#allocation5], %s554_s6 }
  0x3e   : > { %808 = dma.done.wait (%p925_p8), %s243_s0, 128  }
  0x3f   : > { %810 = vsyncadd (%p925_p8), %s243_s0, 4294967168  ;;  %s1002_s13 = scalar_lea.vmem [#allocation8], %s988_s5  ;;  %v845_v0 = vmov 0.0   ;;  %s1006_s9 = scalar_lea.vmem [#allocation7], %s988_s5  ;;  %v290_v1 = vld [vmem:[%s237_s11] sm:$0xff]  ;;  %v291_v12 = vld [vmem:[%s246_s22] sm:$0xff] }
  0x40   : > { %288 = vst [vmem:[%s1002_s13] sm:$0x1] %v845_v0  ;;  %287 = vst [vmem:[%s1006_s9] sm:$0x1] %v845_v0  ;;  %s1010_s26 = scalar_lea.vmem [#allocation10], %s988_s5  ;;  %v292_v2 = vand.u32 2147483647, %v290_v1  ;;  %v299_v7 = vsub.f32 0.0, %v290_v1 }
  0x41   : > { %289 = vst [vmem:[%s1010_s26] sm:$0x1] %v845_v0  ;;  %v303_v10 = vmax.f32 %v290_v1, 0.0  ;;  %v307_v18 = vsub.f32 1.0, %v291_v12  ;;  %vm314_vm0 = vcmp.ge.f32.partialorder %v290_v1, 0.0  ;;  %s350_s27 = sand.u32 1, %s905_s21   ;;  %s556_s24 = sshll.u32 %s833_s18, 4 }
  0x42   : > { %v293_v3 = vsub.f32 0.0, %v292_v2  ;;  %v300_v9 = vmax.f32 %v299_v7, 0.0  ;;  %s380_s8 = sshll.u32 %s1002_s13, 4  ;;  %s393_s25 = sshll.u32 %s1010_s26, 4  ;;  %s1026_s8 = int_to_ptr.vmem [resolvable:$true] %s380_s8  ;;  %s1035_s25 = int_to_ptr.vmem [resolvable:$true] %s393_s25 }
  0x43   : > { %s367_s10 = sshll.u32 %s1006_s9, 4  ;;  %s1024_s21 = scalar_lea.hbm %s1138_s3, %s556_s24  ;;  %s1033_s10 = int_to_ptr.vmem [resolvable:$true] %s367_s10 }
  0x44   : > { %v294_v4 = vmul.f32 1.442695, %v293_v3  ;;  %s1031_s7 = scalar_lea.hbm %s1137_s2, %s556_s24  ;;  %s1043_s22 = scalar_lea.hbm %s1139_s4, %s556_s24 }
  0x45   : > { %s1045_s12 = scalar_lea.sflag [#allocation9], %s350_s27  ;;  %s701_s14 = scalar_lea.vmem %s1026_s8, 16 }
  0x46   : > { %639 = vpow2.f32 %v294_v4  ;;  %p702_p8 = scmp.ne.s32.totalorder %s1026_s8, %s701_s14  ;;  %s846_s18 = smov [#allocation8]  }
  0x47   : > { %v326_v44 = vld [vmem:[%s1002_s13] sm:$0x1]  ;;  %s705_s6 = sshll.u32 %s846_s18, 4  ;;  %s706_s6 = int_to_ptr.vmem [resolvable:$false] %s705_s6 }
  0x48   : > { %v317_v45 = vld [vmem:[%s1006_s9] sm:$0x1]  ;;  %p703_p0 = pnand %p702_p8, %p929_p9  ;;  %s707_s1 = scalar_lea.vmem %s706_s6, 32 }
  0x49   : > { %v336_v46 = vld [vmem:[%s1010_s26] sm:$0x1]  ;;  %p708_p13 = scmp.lt.s32.totalorder %s1026_s8, %s706_s6  ;;  %p709_p5 = scmp.lt.s32.totalorder %s707_s1, %s701_s14 }
  0x4a   : > { %p704_p3 = pneg %p703_p0 }
  0x4b   : > { %p710_p12 = por %p709_p5, %p708_p13 }
  0x4d   : > { %p711_p6 = pnand %p710_p12, %p704_p3 }
  0x53   : > { %v640_v5 = vpop.eup %639 }
  0x54   : > { %v296_v6 = vadd.f32 1.0, %v640_v5 }
  0x56   : > { %641 = vrcp.f32 %v296_v6 }
  0x57   : > { %643 = vlog2.f32 %v296_v6 }
  0x63   : > { %v642_v8 = vpop.eup %641 }
  0x64   : > { %v644_v11 = vpop.eup %643  ;;  %v311_v13 = vmul.f32 %v642_v8, %v296_v6 }
  0x65   : > { %v298_v14 = vmul.f32 0.6931472, %v644_v11 }
  0x66   : > { %v312_v15 = vsub.f32 2.0, %v311_v13 }
  0x67   : > { %v301_v16 = vadd.f32 %v300_v9, %v298_v14  ;;  %v304_v17 = vadd.f32 %v303_v10, %v298_v14 }
  0x68   : > { %v313_v19 = vmul.f32 %v642_v8, %v312_v15 }
  0x69   : > { %v302_v20 = vmin.f32 %v301_v16, 100.0  ;;  %v305_v21 = vmin.f32 %v304_v17, 100.0 }
  0x6a   : > { %v315_v22 = vmul.f32 %v640_v5, %v313_v19 }
  0x6b   : > { %v306_v23 = vmul.f32 %v302_v20, %v291_v12  ;;  %v308_v24 = vmul.f32 %v307_v18, %v305_v21 }
  0x6c   : > { %v316_v25 = vsel %vm314_vm0, %v313_v19, %v315_v22 }
  0x6d   : > { %v327_v26 = vmul.f32 %v316_v25, %v291_v12  ;;  %v309_v27 = vadd.f32 %v308_v24, %v306_v23  ;;  %v337_v28 = vadd.f32 %v316_v25, %v291_v12 }
  0x6f   : > { %v328_v29 = vrot.slane %v327_v26, 4  ;;  %v318_v30 = vrot.slane %v309_v27, 4  ;;  %v338_v31 = vrot.slane %v337_v28, 4 }
  0x71   : > { %v329_v32 = vadd.f32 %v328_v29, %v327_v26  ;;  %v319_v33 = vadd.f32 %v318_v30, %v309_v27  ;;  %v339_v34 = vadd.f32 %v338_v31, %v337_v28 }
  0x73   : > { %v330_v35 = vrot.slane %v329_v32, 2  ;;  %v320_v36 = vrot.slane %v319_v33, 2  ;;  %v340_v37 = vrot.slane %v339_v34, 2 }
  0x75   : > { %v331_v38 = vadd.f32 %v330_v35, %v329_v32  ;;  %v321_v39 = vadd.f32 %v320_v36, %v319_v33  ;;  %v341_v40 = vadd.f32 %v340_v37, %v339_v34 }
  0x77   : > { %v332_v41 = vrot.slane %v331_v38, 1  ;;  %v322_v42 = vrot.slane %v321_v39, 1  ;;  %v342_v43 = vrot.slane %v341_v40, 1 }
  0x79   : > { %v333_v47 = vadd.f32 %v332_v41, %v331_v38  ;;  %v323_v48 = vadd.f32 %v322_v42, %v321_v39  ;;  %v343_v49 = vadd.f32 %v342_v43, %v341_v40 }
  0x7b   : > { %v334_v50 = vadd.f32 %v333_v47, %v326_v44  ;;  %v324_v51 = vadd.f32 %v323_v48, %v317_v45  ;;  %v344_v52 = vadd.f32 %v343_v49, %v336_v46 }
  0x7d   : > { %335 = vst [vmem:[%s1002_s13] sm:$0x1] %v334_v50  ;;  %325 = vst [vmem:[%s1006_s9] sm:$0x1] %v324_v51 }
  0x7e   : > { %345 = vst [vmem:[%s1010_s26] sm:$0x1] %v344_v52 }
  0x7f   : > { %714 = shalt.err (!%p711_p6)
}
  0x80   : > { %s715_s13 = scalar_lea.hbm %s1024_s21, 16  ;;  %s719_s27 = scalar_lea.hbm %s1138_s3, 32 }
  0x81   : > { %p716_p7 = scmp.ne.s32.totalorder %s1024_s21, %s715_s13  ;;  %p720_p4 = scmp.lt.s32.totalorder %s1024_s21, %s1138_s3 }
  0x82   : > { %p721_p10 = scmp.lt.s32.totalorder %s719_s27, %s715_s13 }
  0x83   : > { %p717_p1 = pnand %p716_p7, %p929_p9 }
  0x84   : > { %p722_p8 = por %p721_p10, %p720_p4 }
  0x85   : > { %p718_p2 = pneg %p717_p1 }
  0x87   : > { %p723_p0 = pnand %p722_p8, %p718_p2 }
  0x89   : > { %726 = shalt.err (!%p723_p0)
}
  0x8a   : > { %566 = dma.vmem_to_hbm [thread:$0]  (%p929_p9), %s1026_s8, 16, %s1024_s21, %s1045_s12  }
  0x8b   : > { %s347_s1 = scalar_lea.sflag [#allocation4], %s988_s5  ;;  %s727_s0 = scalar_lea.vmem %s1033_s10, 16 }
  0x8c   : > { %p728_p3 = scmp.ne.s32.totalorder %s1033_s10, %s727_s0  ;;  %s847_s14 = smov [#allocation7]  }
  0x8d   : > { %s731_s18 = sshll.u32 %s847_s14, 4  ;;  %s732_s18 = int_to_ptr.vmem [resolvable:$false] %s731_s18 }
  0x8e   : > { %p729_p13 = pnand %p728_p3, %p929_p9  ;;  %s733_s6 = scalar_lea.vmem %s732_s18, 32 }
  0x8f   : > { %p734_p12 = scmp.lt.s32.totalorder %s1033_s10, %s732_s18  ;;  %p735_p6 = scmp.lt.s32.totalorder %s733_s6, %s727_s0 }
  0x90   : > { %p730_p5 = pneg %p729_p13 }
  0x91   : > { %p736_p7 = por %p735_p6, %p734_p12 }
  0x93   : > { %p737_p1 = pnand %p736_p7, %p730_p5 }
  0x95   : > { %740 = shalt.err (!%p737_p1)
}
  0x96   : > { %s741_s8 = scalar_lea.hbm %s1031_s7, 16  ;;  %s745_s13 = scalar_lea.hbm %s1137_s2, 32 }
  0x97   : > { %p742_p2 = scmp.ne.s32.totalorder %s1031_s7, %s741_s8  ;;  %p746_p8 = scmp.lt.s32.totalorder %s1031_s7, %s1137_s2 }
  0x98   : > { %p747_p0 = scmp.lt.s32.totalorder %s745_s13, %s741_s8 }
  0x99   : > { %p743_p4 = pnand %p742_p2, %p929_p9 }
  0x9a   : > { %p748_p3 = por %p747_p0, %p746_p8 }
  0x9b   : > { %p744_p10 = pneg %p743_p4 }
  0x9d   : > { %p749_p13 = pnand %p748_p3, %p744_p10 }
  0x9f   : > { %752 = shalt.err (!%p749_p13)
}
  0xa0   : > { %565 = dma.vmem_to_hbm [thread:$0]  (%p929_p9), %s1033_s10, 16, %s1031_s7, %s347_s1  }
  0xa1   : > { %s753_s27 = scalar_lea.vmem %s1035_s25, 16  ;;  %s848_s24 = smov [#allocation10]  }
  0xa2   : > { %p754_p5 = scmp.ne.s32.totalorder %s1035_s25, %s753_s27  ;;  %s757_s11 = sshll.u32 %s848_s24, 4  ;;  %s758_s11 = int_to_ptr.vmem [resolvable:$false] %s757_s11 }
  0xa3   : > { %s759_s0 = scalar_lea.vmem %s758_s11, 32  ;;  %p760_p7 = scmp.lt.s32.totalorder %s1035_s25, %s758_s11 }
  0xa4   : > { %p755_p12 = pnand %p754_p5, %p929_p9  ;;  %p761_p1 = scmp.lt.s32.totalorder %s759_s0, %s753_s27 }
  0xa6   : > { %p756_p6 = pneg %p755_p12  ;;  %p762_p2 = por %p761_p1, %p760_p7 }
  0xa8   : > { %p763_p4 = pnand %p762_p2, %p756_p6 }
  0xaa   : > { %766 = shalt.err (!%p763_p4)
}
  0xab   : > { %s767_s14 = scalar_lea.hbm %s1043_s22, 16  ;;  %s771_s1 = scalar_lea.hbm %s1139_s4, 32 }
  0xac   : > { %p768_p10 = scmp.ne.s32.totalorder %s1043_s22, %s767_s14  ;;  %p772_p3 = scmp.lt.s32.totalorder %s1043_s22, %s1139_s4 }
  0xad   : > { %p773_p13 = scmp.lt.s32.totalorder %s771_s1, %s767_s14 }
  0xae   : > { %p769_p8 = pnand %p768_p10, %p929_p9 }
  0xaf   : > { %p774_p5 = por %p773_p13, %p772_p3 }
  0xb0   : > { %p770_p0 = pneg %p769_p8 }
  0xb2   : > { %p775_p12 = pnand %p774_p5, %p770_p0 }
  0xb4   : > { %778 = shalt.err (!%p775_p12)
}
  0xb5   : > { %567 = dma.vmem_to_hbm [thread:$0]  (%p929_p9), %s1035_s25, 16, %s1043_s22, %s1045_s12  }
  0xb6 PF: > { %s405_s8 = sand.u32 1, %s821_s15   ;;  %p1151_p6 = scmp.ge.s32.totalorder %s841_s20, 2 }
  0xb7   : > { %s406_s5 = scalar_lea.sflag [#allocation4], %s405_s8 }
  0xb8   : > { %p579_p7 = pnand %p1151_p6, %p938_p11 }
  0xba   : > { %p580_p1 = pneg %p579_p7 }
  0xbc   : > { %812 = dma.done.wait (%p580_p1), %s406_s5, 16  }
  0xbd   : > { %814 = vsyncadd (%p580_p1), %s406_s5, 4294967280  ;;  %s1152_s21 = sadd.s32 4294967294, %s841_s20  }
  0xbe   : > { %s413_s13 = sand.u32 1, %s1152_s21  }
  0xbf   : > { %s414_s28 = scalar_lea.sflag [#allocation9], %s413_s13 }
  0xc0   : > { %816 = dma.done.wait (%p580_p1), %s414_s28, 32  }
  0xc1   : > { %818 = vsyncadd (%p580_p1), %s414_s28, 4294967264  ;;  %s27_s20 = sadd.s32 1, %s841_s20   ;;  %s1153_s15 = smov %s825_s16 }
  0xc2   : > { %p24_p9 = scmp.ge.s32.totalorder %s27_s20, 4   ;;  %s1154_s16 = smov %s829_s17 }
  0xc3   : > { %s1155_s17 = smov %s936_s29  ;;  %s1156_s18 = smov %s837_s19 }
  0xc4   : > { %s1157_s19 = smov %s1159_s23  ;;  %26 = sbr.rel (!%p24_p9) target bundleno = 13 (0xd), region = 122 }
  0xc9   :  { %426 = vsyncpa [#allocation3], 1 }
  0xca   :  { %428 = vsyncpa [#allocation3 + $0x1], 1 }
  0xcb   :  { %429 = vsyncpa [#allocation6], 1 }
  0xcc   :  { %431 = vsyncpa [#allocation6 + $0x1], 1 }
  0xcd   :  { %432 = vsyncpa [#allocation4], 1 }
  0xce   :  { %434 = vsyncpa [#allocation4 + $0x1], 1 }
  0xcf   :  { %435 = vsyncpa [#allocation9], 1 }
  0xd0   :  { %437 = vsyncpa [#allocation9 + $0x1], 1 }

</bundles_post_ra>
